<compile_context>
chip_gen: v5e
topology: v5e:2x2
jax: 0.10.0
libtpu: 0.0.40
codegen_flags: <defaults>
</compile_context>

<pallas_src>
import jax
import jax.numpy as jnp
import numpy as np
from jax.experimental import pallas as pl
from jax.experimental.pallas import tpu as pltpu

NUM_INPUTS = 220
HIDDEN = 128
NUM_OUTPUTS = 4
HEAD_PAD = 8       # cols 0:4 = value + advantage, col 4 = row advantage sum, 5:8 pad


def _round_up(x, m):
    return (x + m - 1) // m * m


def _choose_tile(b, tb_max=1024):
    # Balanced tiles, multiple of 8 rows, and >= 2 tiles whenever possible so
    # v7x's two TensorCores both get work under dimension_semantics=parallel.
    n_tiles = max(pl.cdiv(b, tb_max), 2)
    return _round_up(pl.cdiv(b, n_tiles), 8)


def dueling_kernel(x_ref, w1_ref, b1_ref, wh_ref, bh_ref, out_ref):
    # hidden = tanh(x @ W1 + b1): bf16 MXU operands, f32 accumulation + tanh.
    xb = x_ref[...].astype(jnp.bfloat16)
    h = jnp.tanh(
        jnp.dot(xb, w1_ref[...], preferred_element_type=jnp.float32)
        + b1_ref[...]
    )
    # Fused head (value broadcast + advantage row-sum baked into the weights):
    # plain matmul + bias + store, no post-processing.
    head = (
        jnp.dot(h.astype(jnp.bfloat16), wh_ref[...],
                preferred_element_type=jnp.float32)
        + bh_ref[...]
    )
    out_ref[...] = head.astype(out_ref.dtype)


def _prepare_params(w1, b1, wa, ba, wv, bv):
    # Fuse heads into one [128, 8] weight:
    #   cols 0:4 -> advantage_j + value   (wa[:, j] + wv)
    #   col    4 -> sum_j advantage_j     (wa.sum(axis=1))
    #   cols 5:8 -> zero pad
    wh = jnp.zeros((HIDDEN, HEAD_PAD), jnp.float32)
    wh = wh.at[:, :NUM_OUTPUTS].set(wa + wv)             # (128,4) + (128,1)
    wh = wh.at[:, NUM_OUTPUTS].set(jnp.sum(wa, axis=1))
    bh = jnp.zeros((1, HEAD_PAD), jnp.float32)
    bh = bh.at[:, :NUM_OUTPUTS].set(ba + bv)             # (1,4) + (1,1)
    bh = bh.at[:, NUM_OUTPUTS].set(jnp.sum(ba))
    return (w1.astype(jnp.bfloat16), b1.astype(jnp.float32),
            wh.astype(jnp.bfloat16), bh)


@jax.jit
def dueling_forward(x, w1, b1, wa, ba, wv, bv):
    B = x.shape[0]
    w1b, b1p, wh, bh = _prepare_params(w1, b1, wa, ba, wv, bv)

    # Only tiny batches (< 8 rows) get padded; everything else streams as-is.
    if B < 8:
        xp = jnp.zeros((8, NUM_INPUTS), x.dtype).at[:B, :].set(x)
    else:
        xp = x
    Bp = xp.shape[0]

    tb = _choose_tile(Bp)
    grid = (pl.cdiv(Bp, tb),)

    flops = 2 * Bp * (NUM_INPUTS * HIDDEN + HIDDEN * HEAD_PAD)
    bytes_accessed = (
        Bp * NUM_INPUTS * 4                 # x, f32, streamed
        + NUM_INPUTS * HIDDEN * 2           # W1 bf16 (resident)
        + HIDDEN * 4                        # b1 f32
        + HIDDEN * HEAD_PAD * 2             # fused head W bf16
        + HEAD_PAD * 4                      # fused head b f32
        + Bp * HEAD_PAD * 4                 # output slab f32
    )

    head = pl.pallas_call(
        dueling_kernel,
        out_shape=jax.ShapeDtypeStruct((Bp, HEAD_PAD), jnp.float32),
        grid=grid,
        in_specs=[
            pl.BlockSpec((tb, NUM_INPUTS), lambda i: (i, 0)),     # x tile (f32)
            pl.BlockSpec((NUM_INPUTS, HIDDEN), lambda i: (0, 0)),  # W1 (resident)
            pl.BlockSpec((1, HIDDEN), lambda i: (0, 0)),           # b1
            pl.BlockSpec((HIDDEN, HEAD_PAD), lambda i: (0, 0)),    # fused head W
            pl.BlockSpec((1, HEAD_PAD), lambda i: (0, 0)),         # fused head b
        ],
        out_specs=pl.BlockSpec((tb, HEAD_PAD), lambda i: (i, 0)),
        compiler_params=pltpu.CompilerParams(
            dimension_semantics=("parallel",)),
        cost_estimate=pl.CostEstimate(
            flops=flops,
            transcendentals=Bp * HIDDEN,
            bytes_accessed=bytes_accessed),
    )(xp, w1b, b1p, wh, bh)

    head = head[:B]                                # drop any tiny-batch padding
    combined = head[:, :NUM_OUTPUTS]               # value + advantage per row
    adv_total = jnp.sum(head[:, NUM_OUTPUTS])      # sum of advantage (real rows)
    # Global mean over all B*NUM_OUTPUTS advantage elements (torch .mean()):
    return combined - adv_total / (B * NUM_OUTPUTS)


def init_linear(key, fan_in, fan_out):
    # torch.nn.Linear default init: U(-1/sqrt(fan_in), 1/sqrt(fan_in))
    kw, kb = jax.random.split(key)
    bound = 1.0 / np.sqrt(fan_in)
    w = jax.random.uniform(kw, (fan_in, fan_out), jnp.float32, -bound, bound)
    b = jax.random.uniform(kb, (1, fan_out), jnp.float32, -bound, bound)
    return w, b


def reference_forward_f32(x, w1, b1, wa, ba, wv, bv):
    h = jnp.tanh(x @ w1 + b1)
    adv = h @ wa + ba
    val = h @ wv + bv
    return val + adv - jnp.mean(adv)


def reference_forward_emulated(x, w1, b1, wa, ba, wv, bv):
    # Replicates the kernel's numerics exactly: folded head weights, bf16
    # matmul operands, f32 accumulation, f32 tanh, wrapper-side global mean.
    B = x.shape[0]
    w1b, b1p, wh, bh = _prepare_params(w1, b1, wa, ba, wv, bv)
    h = jnp.tanh(jnp.dot(x.astype(jnp.bfloat16), w1b,
                         preferred_element_type=jnp.float32) + b1p)
    head = jnp.dot(h.astype(jnp.bfloat16), wh,
                   preferred_element_type=jnp.float32) + bh
    combined = head[:, :NUM_OUTPUTS]
    adv_total = jnp.sum(head[:, NUM_OUTPUTS])
    return combined - adv_total / (B * NUM_OUTPUTS)


if __name__ == "__main__":
    key = jax.random.PRNGKey(0)
    k_x, k1, k2, k3 = jax.random.split(key, 4)

    B = 12   # exercises 2 batch tiles + a ragged (masked) tail block
    x = jax.random.normal(k_x, (B, NUM_INPUTS), jnp.float32)

    w1, b1 = init_linear(k1, NUM_INPUTS, HIDDEN)
    wa, ba = init_linear(k2, HIDDEN, NUM_OUTPUTS)
    wv, bv = init_linear(k3, HIDDEN, 1)

    out = dueling_forward(x, w1, b1, wa, ba, wv, bv)
    out = jax.block_until_ready(out)

    ref_emu = reference_forward_emulated(x, w1, b1, wa, ba, wv, bv)
    ref_f32 = reference_forward_f32(x, w1, b1, wa, ba, wv, bv)
    # Tight check vs a reference with matching folded-bf16 numerics ...
    np.testing.assert_allclose(np.asarray(out), np.asarray(ref_emu),
                               rtol=5e-3, atol=5e-3)
    # ... and a loose semantics check vs the pure-f32 torch-equivalent path.
    np.testing.assert_allclose(np.asarray(out), np.asarray(ref_f32),
                               rtol=5e-2, atol=5e-2)

    print("KERNEL_OK")
</pallas_src>

<mosaic_0001>
module attributes {stable_mosaic.version = 11 : i64} {
  func.func @dueling_kernel(%arg0: i32, %arg1: memref<8x220xf32, #tpu.memory_space<vmem>>, %arg2: memref<220x128xbf16, #tpu.memory_space<vmem>>, %arg3: memref<1x128xf32, #tpu.memory_space<vmem>>, %arg4: memref<128x8xbf16, #tpu.memory_space<vmem>>, %arg5: memref<1x8xf32, #tpu.memory_space<vmem>>, %arg6: memref<8x8xf32, #tpu.memory_space<vmem>>) attributes {dimension_semantics = [#tpu.dimension_semantics<parallel>], iteration_bounds = array<i64: 2>, scalar_prefetch = 0 : i64, scratch_operands = 0 : i64, tpu.core_type = #tpu.core_type<tc>, window_params = [{transform_indices = @transform_0, window_bounds = array<i64: 8, 220>}, {pipeline_mode = #tpu.pipeline_mode<synchronous>, transform_indices = @transform_1, window_bounds = array<i64: 220, 128>}, {pipeline_mode = #tpu.pipeline_mode<synchronous>, transform_indices = @transform_2, window_bounds = array<i64: 1, 128>}, {pipeline_mode = #tpu.pipeline_mode<synchronous>, transform_indices = @transform_3, window_bounds = array<i64: 128, 8>}, {pipeline_mode = #tpu.pipeline_mode<synchronous>, transform_indices = @transform_4, window_bounds = array<i64: 1, 8>}, {transform_indices = @transform_5, window_bounds = array<i64: 8, 8>}]} {
    %c0 = arith.constant 0 : index
    %c0_0 = arith.constant 0 : index
    %0 = vector.load %arg1[%c0, %c0_0] : memref<8x220xf32, #tpu.memory_space<vmem>>, vector<8x220xf32>
    %1 = arith.truncf %0 : vector<8x220xf32> to vector<8x220xbf16>
    %c0_1 = arith.constant 0 : index
    %c0_2 = arith.constant 0 : index
    %2 = vector.load %arg2[%c0_1, %c0_2] : memref<220x128xbf16, #tpu.memory_space<vmem>>, vector<220x128xbf16>
    %cst = arith.constant dense<0.000000e+00> : vector<8x128xf32>
    %3 = tpu.matmul %1, %2, %cst {dimension_numbers = #tpu.dot_dimension_numbers<[1], [0], [0], [1], [0, 0, 1, 1], [], []>} : vector<8x220xbf16>, vector<220x128xbf16>, vector<8x128xf32> -> vector<8x128xf32>
    %c0_3 = arith.constant 0 : index
    %c0_4 = arith.constant 0 : index
    %4 = vector.load %arg3[%c0_3, %c0_4] : memref<1x128xf32, #tpu.memory_space<vmem>>, vector<1x128xf32>
    %5 = vector.broadcast %4 : vector<1x128xf32> to vector<8x128xf32>
    %6 = arith.addf %3, %5 : vector<8x128xf32>
    %7 = math.tanh %6 : vector<8x128xf32>
    %8 = arith.truncf %7 : vector<8x128xf32> to vector<8x128xbf16>
    %c0_5 = arith.constant 0 : index
    %c0_6 = arith.constant 0 : index
    %9 = vector.load %arg4[%c0_5, %c0_6] : memref<128x8xbf16, #tpu.memory_space<vmem>>, vector<128x8xbf16>
    %cst_7 = arith.constant dense<0.000000e+00> : vector<8x8xf32>
    %10 = tpu.matmul %8, %9, %cst_7 {dimension_numbers = #tpu.dot_dimension_numbers<[1], [0], [0], [1], [0, 0, 1, 1], [], []>} : vector<8x128xbf16>, vector<128x8xbf16>, vector<8x8xf32> -> vector<8x8xf32>
    %c0_8 = arith.constant 0 : index
    %c0_9 = arith.constant 0 : index
    %11 = vector.load %arg5[%c0_8, %c0_9] : memref<1x8xf32, #tpu.memory_space<vmem>>, vector<1x8xf32>
    %12 = vector.broadcast %11 : vector<1x8xf32> to vector<8x8xf32>
    %13 = arith.addf %10, %12 : vector<8x8xf32>
    %c0_10 = arith.constant 0 : index
    %c0_11 = arith.constant 0 : index
    %14 = vector.load %arg6[%c0_10, %c0_11] : memref<8x8xf32, #tpu.memory_space<vmem>>, vector<8x8xf32>
    tpu.vector_store %arg6[%c0_10, %c0_11], %13 {strides = array<i32>} : memref<8x8xf32, #tpu.memory_space<vmem>>, vector<8x8xf32>,
    return
  }
  func.func @transform_0(%arg0: i32) -> (i32, i32) {
    %c0_i32 = arith.constant 0 : i32
    %c0_i32_0 = arith.constant 0 : i32
    return %arg0, %c0_i32 : i32, i32
  }
  func.func @transform_1(%arg0: i32) -> (i32, i32) {
    %c0_i32 = arith.constant 0 : i32
    %c0_i32_0 = arith.constant 0 : i32
    %c0_i32_1 = arith.constant 0 : i32
    return %c0_i32, %c0_i32_0 : i32, i32
  }
  func.func @transform_2(%arg0: i32) -> (i32, i32) {
    %c0_i32 = arith.constant 0 : i32
    %c0_i32_0 = arith.constant 0 : i32
    %c0_i32_1 = arith.constant 0 : i32
    return %c0_i32, %c0_i32_0 : i32, i32
  }
  func.func @transform_3(%arg0: i32) -> (i32, i32) {
    %c0_i32 = arith.constant 0 : i32
    %c0_i32_0 = arith.constant 0 : i32
    %c0_i32_1 = arith.constant 0 : i32
    return %c0_i32, %c0_i32_0 : i32, i32
  }
  func.func @transform_4(%arg0: i32) -> (i32, i32) {
    %c0_i32 = arith.constant 0 : i32
    %c0_i32_0 = arith.constant 0 : i32
    %c0_i32_1 = arith.constant 0 : i32
    return %c0_i32, %c0_i32_0 : i32, i32
  }
  func.func @transform_5(%arg0: i32) -> (i32, i32) {
    %c0_i32 = arith.constant 0 : i32
    %c0_i32_0 = arith.constant 0 : i32
    return %arg0, %c0_i32 : i32, i32
  }
}

</mosaic_0001>

<bundles_post_ra>
// kernel: dueling_forward.1
= control target key start
LH: loop header
LB: loop body
LE: loop exit
PB: predicated region body
PF: predicated region fallthrough
CT: control target
= control target key end

     0   :  { %s687_s18 = smov 0   ;;  %s783_s0 = inlined_call_operand.vmem [shape: f32[12,220], index: 0, kind: input, shape index: {}]   ;;  %s784_s1 = inlined_call_operand.vmem [shape: bf16[220,128], index: 1, kind: input, shape index: {}]   ;;  %s785_s2 = inlined_call_operand.vmem [shape: f32[1,128], index: 2, kind: input, shape index: {}]   ;;  %s786_s3 = inlined_call_operand.vmem [shape: bf16[128,8], index: 3, kind: input, shape index: {}]   ;;  %s787_s4 = inlined_call_operand.vmem [shape: f32[1,8], index: 4, kind: input, shape index: {}]   ;;  %s788_s5 = inlined_call_operand.vmem [shape: f32[12,8], index: 5, kind: output, shape index: {}]  }
   0x1 LB: > { %s515_s19 = sadd.s32 4294967295, %s655_s18   ;;  %p519_p0 = scmp.ge.s32.totalorder %s655_s18, 1  ;;  %s655_s18 = sphi %s687_s18, %s15_s18  }
   0x2   : > { %p187_p1 = scmp.lt.s32.totalorder %s655_s18, 3 }
   0x4   : > { %p188_p2 = pnand %p519_p0, %p187_p1 }
   0x5   : > { %p214_p3 = scmp.lt.s32.totalorder (!%p188_p2), %s515_s19, 1 }
   0x6   : > { %191 = sbr.rel (%p188_p2) target bundleno = 322 (0x142), region = 40 }
   0xb   : > { %v622_v0 = vld [vmem:[%s784_s1 + $0x38] sm:$0xff]  ;;  %v577_v1 = vld [vmem:[%s784_s1 + $0x68] sm:$0xf]  ;;  %v628_v2 = vld [vmem:[%s784_s1 + $0x68] sm:$0x30]  ;;  %vm347_vm0 = vcmask 1045504  }
   0xc   : > { %v578_v3 = vor.u32 %v628_v2, %v577_v1  ;;  %351 = vmatpush.bf16.msra.mxu0 %v622_v0  ;;  %v621_v4 = vld [vmem:[%s784_s1 + $0x30] sm:$0xff]  ;;  %v627_v6 = vld [vmem:[%s784_s1 + $0x60] sm:$0xff]  ;;  %v636_v7 = vld [vmem:[%s786_s3 + $0x38] sm:$0xff]  ;;  %s790_s19 = smov (!%p214_p3, %s515_s19), 1  ;;  %vm343_vm1 = vcmask 752640   ;;  %vm460_vm2 = vcmask 64512  }
   0xd   : > { %v620_v8 = vld [vmem:[%s784_s1 + $0x28] sm:$0xff]  ;;  %447 = vmatpush.bf16.msra.mxu2 %v636_v7  ;;  %v635_v9 = vld [vmem:[%s786_s3 + $0x30] sm:$0xff]  ;;  %v626_v10 = vld [vmem:[%s784_s1 + $0x58] sm:$0xff]  ;;  %s614_s23 = sshll.u32 %s790_s19, 4  ;;  %s522_s26 = sshll.u32 %s790_s19, 3 }
   0xe   : > { %v349_v5 = vsel %vm347_vm0, %v578_v3, 0  ;;  %v619_v11 = vld [vmem:[%s784_s1 + $0x20] sm:$0xff]  ;;  %v634_v12 = vld [vmem:[%s786_s3 + $0x28] sm:$0xff]  ;;  %v625_v13 = vld [vmem:[%s784_s1 + $0x50] sm:$0xff]  ;;  %s218_s28 = scalar_lea.vmem %s783_s0, %s614_s23  ;;  %s222_s6 = scalar_lea.vmem %s788_s5, %s522_s26 }
   0xf   : > { %366 = vmatpush.bf16.msra.mxu1 %v349_v5  ;;  %v618_v14 = vld [vmem:[%s784_s1 + $0x18] sm:$0xff]  ;;  %v624_v15 = vld [vmem:[%s784_s1 + $0x48] sm:$0xff]  ;;  %v617_v16 = vld [vmem:[%s784_s1 + $0x10] sm:$0xff] }
  0x10   : > { %352 = vmatpush.bf16.msra.mxu0 %v621_v4  ;;  %v623_v17 = vld [vmem:[%s784_s1 + $0x40] sm:$0xff]  ;;  %v225_v18 = vld [vmem:[%s218_s28 + $0x8] sm:$0xff]  ;;  %v632_v25 = vld [vmem:[%s786_s3 + $0x18] sm:$0xff] }
  0x11   : > { %448 = vmatpush.bf16.msra.mxu2 %v635_v9  ;;  %v616_v19 = vld [vmem:[%s784_s1 + $0x8] sm:$0xff]  ;;  %v227_v20 = vpack.c.bf16 %v225_v18, %v225_v18  ;;  %v615_v21 = vld [vmem:[%s784_s1] sm:$0xff]  ;;  %v631_v26 = vld [vmem:[%s786_s3 + $0x10] sm:$0xff] }
  0x12   : > { %v224_v22 = vld [vmem:[%s218_s28] sm:$0xff]  ;;  %v630_v27 = vld [vmem:[%s786_s3 + $0x8] sm:$0xff] }
  0x13   : > { %367 = vmatpush.bf16.msra.mxu1 %v627_v6  ;;  %v226_v23 = vpack.c.bf16 %v224_v22, %v224_v22  ;;  %v633_v24 = vld [vmem:[%s786_s3 + $0x20] sm:$0xff] }
  0x14   : > { %353 = vmatpush.bf16.msra.mxu0 %v620_v8  ;;  %v629_v28 = vld [vmem:[%s786_s3] sm:$0xff] }
  0x15   : > { %449 = vmatpush.bf16.msra.mxu2 %v634_v12  ;;  %v645_v30 = vld [vmem:[%s785_s2] ss:$0 sm:$0xff] }
  0x16   : > { %v646_v38 = vld [vmem:[%s787_s4] ss:$0 sm:$0xff] }
  0x17   : > { %368 = vmatpush.bf16.msra.mxu1 %v626_v10 }
  0x18   : > { %354 = vmatpush.bf16.msra.mxu0 %v619_v11 }
  0x19   : > { %450 = vmatpush.bf16.msra.mxu2 %v633_v24 }
  0x1b   : > { %369 = vmatpush.bf16.msra.mxu1 %v625_v13 }
  0x1c   : > { %355 = vmatpush.bf16.msra.mxu0 %v618_v14 }
  0x1d   : > { %451 = vmatpush.bf16.msra.mxu2 %v632_v25 }
  0x1f   : > { %370 = vmatpush.bf16.msra.mxu1 %v624_v15 }
  0x20   : > { %356 = vmatpush.bf16.msra.mxu0 %v617_v16 }
  0x21   : > { %452 = vmatpush.bf16.msra.mxu2 %v631_v26 }
  0x23   : > { %371 = vmatpush.bf16.msra.mxu1 %v623_v17 }
  0x24   : > { %357 = vmatpush.bf16.msra.mxu0 %v616_v19 }
  0x25   : > { %453 = vmatpush.bf16.msra.mxu2 %v630_v27 }
  0x26   : > { %579 = vmatmul.msk.bf16.vlgmr.msra.gmra.mxu1 %vm343_vm1, %v227_v20 }
  0x28   : > { %358 = vmatpush.bf16.msra.mxu0 %v615_v21 }
  0x29   : > { %454 = vmatpush.bf16.msra.mxu2 %v629_v28 }
  0x2b   : > { %359 = vmatmul.bf16.vlgmr.msra.gmra.mxu0 %v226_v23 }
  0xa3   : > { %v373_v29 = vpop.f32.mrf.mxu1 }
  0xa8   : > { %v360_v31 = vpop.f32.mrf.mxu0 }
  0xa9   : > { %v361_v32 = vadd.f32 %v645_v30, %v360_v31 }
  0xab   : > { %v375_v33 = vpop.f32.mrf.mxu1  ;;  %v374_v34 = vadd.f32 %v373_v29, %v361_v32 }
  0xad   : > { %647 = vtanh.f32 %v374_v34 }
  0xb0   : > { %v362_v35 = vpop.f32.mrf.mxu0 }
  0xb3   : > { %v648_v36 = vpop.eup %647 }
  0xb4   : > { %v378_v37 = vpack.c.bf16 %v648_v36, %v648_v36 }
  0xb6   : > { %455 = vmatmul.bf16.vlgmr.msra.gmra.mxu2 %v378_v37 }
 0x139   : > { %v456_v39 = vpop.f32.mrf.mxu2 }
 0x13a   : > { %v457_v40 = vadd.f32 %v646_v38, %v456_v39 }
 0x13c   : > { %461 = vst.msk [vmem:[%s222_s6] sm:$0xff] %vm460_vm2, %v457_v40 }
 0x141   : > { %v458_v41 = vpop.f32.mrf.mxu2 }
 0x142 PF: > { %s15_s18 = sadd.s32 1, %s655_s18  }
 0x143   : > { %p12_p4 = scmp.ge.s32.totalorder %s15_s18, 4  }
 0x145   :  { %14 = sbr.rel (!%p12_p4) target bundleno = 1 (0x1), region = 70 }

</bundles_post_ra>
